<compile_context>
chip_gen: v5e
topology: v5e:2x2
jax: 0.10.0
libtpu: 0.0.40
codegen_flags: <defaults>
</compile_context>

<pallas_src>
import functools

import jax
import jax.numpy as jnp
from jax.experimental import pallas as pl
from jax.experimental.pallas import tpu as pltpu


def _round_up(x, m):
    return ((x + m - 1) // m) * m


def _cdiv(a, b):
    return (a + b - 1) // b


def _encoder_kernel(h_ref, v_ref, wh_ref, wv_ref, b_ref, o_ref, *, compute_dtype):
    # In-kernel activation cast (VPU op hidden under DMA/MXU) instead of a wrapper-side
    # astype that would cost a full extra HBM pass.
    h = h_ref[...].astype(compute_dtype)
    v = v_ref[...].astype(compute_dtype)
    # split-weight matmul == matmul on concatenated features; f32 accumulation
    acc = jnp.dot(h, wh_ref[...], preferred_element_type=jnp.float32)
    acc = acc + jnp.dot(v, wv_ref[...], preferred_element_type=jnp.float32)
    acc = acc + b_ref[...]                      # (1, S_pad) f32 bias, broadcasts over rows
    o_ref[...] = jnp.tanh(acc).astype(o_ref.dtype)


def _choose_row_tile(N, block_n, H, V, S_pad, in_bytes, out_bytes, w_bytes, vmem_budget):
    """Pick a 16-aligned row tile that fits the VMEM budget and yields >=2 grid steps
    whenever N allows (so the 'parallel' grid axis can use both TensorCores on v7x)."""
    ALIGN = 16  # bf16 sublane packing
    # pinned weights + bias (worst case: 2 pipeline buffers each)
    fixed = 2 * ((H + V) * S_pad * w_bytes + S_pad * 4)
    # double-buffered activation row tiles + output row tile
    per_row = 2 * ((H + V) * in_bytes + S_pad * out_bytes)
    fit_rows = max(ALIGN, ((vmem_budget - fixed) // max(per_row, 1)) // ALIGN * ALIGN)

    tn = min(_round_up(max(block_n, ALIGN), ALIGN), _round_up(N, ALIGN), fit_rows)
    # v7x megacore: guarantee at least 2 grid steps when N is big enough to split.
    if _cdiv(N, tn) == 1 and N > ALIGN:
        tn = _round_up(_cdiv(N, 2), ALIGN)
    return tn


def encoder_forward(encoding, visual_features, weight, bias, *,
                    block_n=1024, compute_dtype=jnp.bfloat16,
                    out_dtype=jnp.bfloat16, keep_padded_cols=False,
                    vmem_budget=28 << 20):
    """encoding: (N, H) f32, visual_features: (N, V) f32,
    weight: (H+V, S) (transposed torch Linear weight), bias: (S,).
    Returns (N, 1, S) out_dtype == tanh(cat([encoding, visual], -1) @ weight + bias)."""
    N, H = encoding.shape
    Nv, V = visual_features.shape
    assert Nv == N, "encoding and visual_features must share the leading dim"
    S = bias.shape[0]

    # --- tiling choices -------------------------------------------------------
    S_pad = _round_up(max(S, 128), 128)          # lane-dense output columns
    in_bytes = jnp.dtype(encoding.dtype).itemsize
    w_bytes = jnp.dtype(compute_dtype).itemsize
    out_bytes = jnp.dtype(out_dtype).itemsize
    TN = _choose_row_tile(N, block_n, H, V, S_pad, in_bytes, out_bytes, w_bytes,
                          vmem_budget)
    grid = (_cdiv(N, TN),)                       # partial last block handled by Pallas

    # --- weight / bias prep (small, one-time) ---------------------------------
    w = weight.astype(compute_dtype)
    w_h = w[:H, :]                                # (H, S)
    w_v = w[H:, :]                                # (V, S)
    b2d = bias.astype(jnp.float32).reshape(1, S)  # bias stays f32
    if S_pad != S:
        w_h = jnp.pad(w_h, ((0, 0), (0, S_pad - S)))
        w_v = jnp.pad(w_v, ((0, 0), (0, S_pad - S)))
        b2d = jnp.pad(b2d, ((0, 0), (0, S_pad - S)))

    cost = pl.CostEstimate(
        flops=2 * N * (H + V) * S_pad,
        transcendentals=N * S_pad,
        bytes_accessed=(N * (H + V) * in_bytes          # activations in (f32, one pass)
                        + (H + V) * S_pad * w_bytes     # weights in
                        + S_pad * 4                     # bias in
                        + N * S_pad * out_bytes),       # output out
    )

    kernel = functools.partial(_encoder_kernel, compute_dtype=compute_dtype)
    out2d = pl.pallas_call(
        kernel,
        out_shape=jax.ShapeDtypeStruct((N, S_pad), out_dtype),
        grid=grid,
        in_specs=[
            pl.BlockSpec((TN, H), lambda i: (i, 0)),         # row tile of encoding (f32)
            pl.BlockSpec((TN, V), lambda i: (i, 0)),         # row tile of visual (f32)
            pl.BlockSpec((H, S_pad), lambda i: (0, 0)),      # weights pinned in VMEM
            pl.BlockSpec((V, S_pad), lambda i: (0, 0)),
            pl.BlockSpec((1, S_pad), lambda i: (0, 0)),      # bias pinned
        ],
        out_specs=pl.BlockSpec((TN, S_pad), lambda i: (i, 0)),
        compiler_params=pltpu.CompilerParams(
            dimension_semantics=("parallel",),               # megacore sharding on v7x
            vmem_limit_bytes=max(vmem_budget + (8 << 20), 32 << 20),
        ),
        cost_estimate=cost,
    )(encoding, visual_features, w_h, w_v, b2d)

    # Only pay for undoing the lane padding when strictly required.
    if S_pad != S and not keep_padded_cols:
        out2d = out2d[:, :S]
    # restore torch's (-1, 1, scale_to) shape (metadata-only reshape)
    return out2d.reshape(N, 1, out2d.shape[-1])


def _reference(encoding, visual_features, weight, bias,
               compute_dtype=jnp.bfloat16, out_dtype=jnp.bfloat16):
    # same bf16 rounding of matmul inputs as the kernel; f32 accumulation / tanh
    h = encoding.astype(compute_dtype).astype(jnp.float32)
    v = visual_features.astype(compute_dtype).astype(jnp.float32)
    w = weight.astype(compute_dtype).astype(jnp.float32)
    x = jnp.concatenate([h, v], axis=-1)
    y = jnp.tanh(x @ w + bias.astype(jnp.float32)).astype(out_dtype)
    return y.reshape(encoding.shape[0], 1, bias.shape[0])


def _check(out, ref):
    assert out.shape == ref.shape, (out.shape, ref.shape)
    assert jnp.allclose(out.astype(jnp.float32), ref.astype(jnp.float32),
                        atol=2e-2, rtol=2e-2)


if __name__ == "__main__":
    key = jax.random.PRNGKey(0)

    # --- small config consistent with the module ------------------------------
    #   hidden_dim=32 (stand-in for BERT pooled dim), visual_features_dim=16,
    #   scale_to=24, N = batch * num_rounds = 2
    N, H, V, S = 2, 32, 16, 24
    k_enc, k_vis, k_w, k_b = jax.random.split(key, 4)
    encoding = jax.random.normal(k_enc, (N, H), dtype=jnp.float32)
    visual_features = jax.random.normal(k_vis, (N, V), dtype=jnp.float32)
    weight = (jax.random.normal(k_w, (H + V, S), dtype=jnp.float32)
              * (1.0 / jnp.sqrt(H + V)))
    bias = jax.random.normal(k_b, (S,), dtype=jnp.float32) * 0.01

    out = jax.block_until_ready(encoder_forward(encoding, visual_features, weight, bias))
    _check(out, _reference(encoding, visual_features, weight, bias))

    # --- config exercising multi-tile grid + partial row tile + padded S ------
    N2, H2, V2, S2 = 300, 128, 64, 200
    k_enc, k_vis, k_w, k_b = jax.random.split(jax.random.PRNGKey(1), 4)
    enc2 = jax.random.normal(k_enc, (N2, H2), dtype=jnp.float32)
    vis2 = jax.random.normal(k_vis, (N2, V2), dtype=jnp.float32)
    w2 = (jax.random.normal(k_w, (H2 + V2, S2), dtype=jnp.float32)
          * (1.0 / jnp.sqrt(H2 + V2)))
    b2 = jax.random.normal(k_b, (S2,), dtype=jnp.float32) * 0.01

    out2 = jax.block_until_ready(encoder_forward(enc2, vis2, w2, b2, block_n=128))
    _check(out2, _reference(enc2, vis2, w2, b2))

    # --- config exercising the two-tile (megacore) split rule ------------------
    N3, H3, V3, S3 = 40, 32, 16, 24
    k_enc, k_vis, k_w, k_b = jax.random.split(jax.random.PRNGKey(2), 4)
    enc3 = jax.random.normal(k_enc, (N3, H3), dtype=jnp.float32)
    vis3 = jax.random.normal(k_vis, (N3, V3), dtype=jnp.float32)
    w3 = (jax.random.normal(k_w, (H3 + V3, S3), dtype=jnp.float32)
          * (1.0 / jnp.sqrt(H3 + V3)))
    b3 = jax.random.normal(k_b, (S3,), dtype=jnp.float32) * 0.01

    out3 = jax.block_until_ready(encoder_forward(enc3, vis3, w3, b3))
    _check(out3, _reference(enc3, vis3, w3, b3))

    print("KERNEL_OK")
</pallas_src>

<mosaic_0001>
module attributes {stable_mosaic.version = 11 : i64} {
  func.func @_encoder_kernel(%arg0: i32, %arg1: memref<16x32xf32, #tpu.memory_space<vmem>>, %arg2: memref<16x16xf32, #tpu.memory_space<vmem>>, %arg3: memref<32x128xbf16, #tpu.memory_space<vmem>>, %arg4: memref<16x128xbf16, #tpu.memory_space<vmem>>, %arg5: memref<1x128xf32, #tpu.memory_space<vmem>>, %arg6: memref<16x128xbf16, #tpu.memory_space<vmem>>) attributes {dimension_semantics = [#tpu.dimension_semantics<parallel>], iteration_bounds = array<i64: 1>, scalar_prefetch = 0 : i64, scratch_operands = 0 : i64, tpu.core_type = #tpu.core_type<tc>, window_params = [{transform_indices = @transform_0, window_bounds = array<i64: 16, 32>}, {transform_indices = @transform_1, window_bounds = array<i64: 16, 16>}, {pipeline_mode = #tpu.pipeline_mode<synchronous>, transform_indices = @transform_2, window_bounds = array<i64: 32, 128>}, {pipeline_mode = #tpu.pipeline_mode<synchronous>, transform_indices = @transform_3, window_bounds = array<i64: 16, 128>}, {pipeline_mode = #tpu.pipeline_mode<synchronous>, transform_indices = @transform_4, window_bounds = array<i64: 1, 128>}, {transform_indices = @transform_5, window_bounds = array<i64: 16, 128>}]} {
    %c0 = arith.constant 0 : index
    %c0_0 = arith.constant 0 : index
    %0 = vector.load %arg1[%c0, %c0_0] : memref<16x32xf32, #tpu.memory_space<vmem>>, vector<16x32xf32>
    %1 = arith.truncf %0 : vector<16x32xf32> to vector<16x32xbf16>
    %c0_1 = arith.constant 0 : index
    %c0_2 = arith.constant 0 : index
    %2 = vector.load %arg2[%c0_1, %c0_2] : memref<16x16xf32, #tpu.memory_space<vmem>>, vector<16x16xf32>
    %3 = arith.truncf %2 : vector<16x16xf32> to vector<16x16xbf16>
    %c0_3 = arith.constant 0 : index
    %c0_4 = arith.constant 0 : index
    %4 = vector.load %arg3[%c0_3, %c0_4] : memref<32x128xbf16, #tpu.memory_space<vmem>>, vector<32x128xbf16>
    %cst = arith.constant dense<0.000000e+00> : vector<16x128xf32>
    %5 = tpu.matmul %1, %4, %cst {dimension_numbers = #tpu.dot_dimension_numbers<[1], [0], [0], [1], [0, 0, 1, 1], [], []>} : vector<16x32xbf16>, vector<32x128xbf16>, vector<16x128xf32> -> vector<16x128xf32>
    %c0_5 = arith.constant 0 : index
    %c0_6 = arith.constant 0 : index
    %6 = vector.load %arg4[%c0_5, %c0_6] : memref<16x128xbf16, #tpu.memory_space<vmem>>, vector<16x128xbf16>
    %cst_7 = arith.constant dense<0.000000e+00> : vector<16x128xf32>
    %7 = tpu.matmul %3, %6, %cst_7 {dimension_numbers = #tpu.dot_dimension_numbers<[1], [0], [0], [1], [0, 0, 1, 1], [], []>} : vector<16x16xbf16>, vector<16x128xbf16>, vector<16x128xf32> -> vector<16x128xf32>
    %8 = arith.addf %5, %7 : vector<16x128xf32>
    %c0_8 = arith.constant 0 : index
    %c0_9 = arith.constant 0 : index
    %9 = vector.load %arg5[%c0_8, %c0_9] : memref<1x128xf32, #tpu.memory_space<vmem>>, vector<1x128xf32>
    %10 = vector.broadcast %9 : vector<1x128xf32> to vector<16x128xf32>
    %11 = arith.addf %8, %10 : vector<16x128xf32>
    %12 = math.tanh %11 : vector<16x128xf32>
    %13 = arith.truncf %12 : vector<16x128xf32> to vector<16x128xbf16>
    %c0_10 = arith.constant 0 : index
    %c0_11 = arith.constant 0 : index
    %14 = vector.load %arg6[%c0_10, %c0_11] : memref<16x128xbf16, #tpu.memory_space<vmem>>, vector<16x128xbf16>
    tpu.vector_store %arg6[%c0_10, %c0_11], %13 {strides = array<i32>} : memref<16x128xbf16, #tpu.memory_space<vmem>>, vector<16x128xbf16>,
    return
  }
  func.func @transform_0(%arg0: i32) -> (i32, i32) {
    %c0_i32 = arith.constant 0 : i32
    %c0_i32_0 = arith.constant 0 : i32
    return %arg0, %c0_i32 : i32, i32
  }
  func.func @transform_1(%arg0: i32) -> (i32, i32) {
    %c0_i32 = arith.constant 0 : i32
    %c0_i32_0 = arith.constant 0 : i32
    return %arg0, %c0_i32 : i32, i32
  }
  func.func @transform_2(%arg0: i32) -> (i32, i32) {
    %c0_i32 = arith.constant 0 : i32
    %c0_i32_0 = arith.constant 0 : i32
    %c0_i32_1 = arith.constant 0 : i32
    return %c0_i32, %c0_i32_0 : i32, i32
  }
  func.func @transform_3(%arg0: i32) -> (i32, i32) {
    %c0_i32 = arith.constant 0 : i32
    %c0_i32_0 = arith.constant 0 : i32
    %c0_i32_1 = arith.constant 0 : i32
    return %c0_i32, %c0_i32_0 : i32, i32
  }
  func.func @transform_4(%arg0: i32) -> (i32, i32) {
    %c0_i32 = arith.constant 0 : i32
    %c0_i32_0 = arith.constant 0 : i32
    %c0_i32_1 = arith.constant 0 : i32
    return %c0_i32, %c0_i32_0 : i32, i32
  }
  func.func @transform_5(%arg0: i32) -> (i32, i32) {
    %c0_i32 = arith.constant 0 : i32
    %c0_i32_0 = arith.constant 0 : i32
    return %arg0, %c0_i32 : i32, i32
  }
}

</mosaic_0001>

<bundles_post_ra>
// kernel: tpu_custom_call.1
= control target key start
LH: loop header
LB: loop body
LE: loop exit
PB: predicated region body
PF: predicated region fallthrough
CT: control target
= control target key end

     0   :  { %10 = vsyncpa [#allocation3], 0  ;;  %s458_s0 = inlined_call_operand.hbm [shape: f32[2,32], index: 0, kind: input, shape index: {}]   ;;  %s459_s1 = inlined_call_operand.hbm [shape: f32[2,16], index: 1, kind: input, shape index: {}]   ;;  %s460_s2 = inlined_call_operand.hbm [shape: bf16[32,128], index: 2, kind: input, shape index: {}]   ;;  %s461_s3 = inlined_call_operand.hbm [shape: bf16[16,128], index: 3, kind: input, shape index: {}]   ;;  %s462_s4 = inlined_call_operand.vmem [shape: f32[1,128], index: 4, kind: input, shape index: {}]   ;;  %s463_s5 = inlined_call_operand.hbm [shape: bf16[2,128], index: 5, kind: output, shape index: {}]  }
   0x1   :  { %11 = vsyncpa [#allocation6], 0 }
   0x2   :  { %12 = vsyncpa [#allocation9], 0 }
   0x3   :  { %13 = vsyncpa [#allocation4], 0 }
   0x4   :  { %17 = vsyncadd [#allocation3], 224  ;;  %s18_s20 = sshll.u32 %s458_s0, 4  ;;  %s391_s21 = smov [#allocation2]   ;;  %s19_s20 = int_to_ptr.hbm [resolvable:$true] %s18_s20 }
   0x5   :  { %s20_s22 = sshll.u32 %s391_s21, 4  ;;  %s392_s23 = smov 32   ;;  %s21_s22 = int_to_ptr.vmem [resolvable:$true] %s20_s22 }
   0x6   :  { %s393_s24 = smov 2  }
   0x7   :  { %26 = dma.hbm_to_vmem [thread:$0]  %s19_s20, 32, %s21_s22, [#allocation3], %s392_s23, %s392_s23, %s393_s24  }
   0x8   :  { %30 = vsyncadd [#allocation6], 224  ;;  %s31_s27 = sshll.u32 %s459_s1, 4  ;;  %s394_s28 = smov [#allocation5]   ;;  %s32_s27 = int_to_ptr.hbm [resolvable:$true] %s31_s27 }
   0x9   :  { %s33_s29 = sshll.u32 %s394_s28, 4  ;;  %s44_s0 = sshll.u32 %s460_s2, 4  ;;  %s34_s29 = int_to_ptr.vmem [resolvable:$true] %s33_s29  ;;  %s45_s0 = int_to_ptr.hbm [resolvable:$true] %s44_s0 }
   0xa   :  { %39 = dma.hbm_to_vmem [thread:$0]  %s32_s27, 32, %s34_s29, [#allocation6], %s392_s23, %s392_s23, %s393_s24  }
   0xb   :  { %s395_s7 = smov [#allocation7]   ;;  %s396_s9 = smov 64  }
   0xc   :  { %s46_s8 = sshll.u32 %s395_s7, 4  ;;  %s397_s10 = smov 4   ;;  %s47_s8 = int_to_ptr.vmem [resolvable:$true] %s46_s8 }
   0xd   :  { %52 = dma.hbm_to_vmem [thread:$0]  %s45_s0, 256, %s47_s8, [#allocation6], %s396_s9, %s396_s9, %s397_s10  }
   0xe   :  { %s57_s1 = sshll.u32 %s461_s3, 4  ;;  %s398_s13 = smov [#allocation8]   ;;  %s58_s1 = int_to_ptr.hbm [resolvable:$true] %s57_s1 }
   0xf   :  { %s59_s14 = sshll.u32 %s398_s13, 4  ;;  %s60_s14 = int_to_ptr.vmem [resolvable:$true] %s59_s14 }
  0x10   :  { %65 = dma.hbm_to_vmem [thread:$0]  %s58_s1, 128, %s60_s14, [#allocation9], %s396_s9, %s396_s9, %s397_s10  }
  0x11   :  { %383 = dma.done.wait [#allocation3], 256  }
  0x12   :  { %384 = vsyncadd [#allocation3], 4294967040 }
  0x13   :  { %385 = dma.done.wait [#allocation6], 512  }
  0x14   :  { %386 = vsyncadd [#allocation6], 4294966784 }
  0x15   :  { %387 = dma.done.wait [#allocation9], 128  }
  0x16   :  { %388 = vsyncadd [#allocation9], 4294967168  ;;  %v246_v0 = vld [vmem:[#allocation8] sm:$0xff]  ;;  %v245_v1 = vld [vmem:[#allocation7 + $0x8] sm:$0xff]  ;;  %vm103_vm0 = vcmask 130048   ;;  %vm133_vm1 = vcmask 261120  }
  0x17   :  { %v88_v2 = vld [vmem:[#allocation5] sm:$0xff]  ;;  %v89_v3 = vld [vmem:[#allocation5 + $0x8] sm:$0xff]  ;;  %v244_v4 = vld [vmem:[#allocation7] sm:$0xff]  ;;  %114 = vmatpush.bf16.msra.mxu0 %v246_v0  ;;  %143 = vmatpush.bf16.msra.mxu1 %v245_v1  ;;  %vm165_vm2 = vcmask 1040384   ;;  %vm169_vm3 = vcmask 1041409   ;;  %vm173_vm4 = vcmask 1042434  }
  0x18   :  { %v90_v5 = vpack.c.bf16 %v89_v3, %v88_v2  ;;  %v85_v6 = vld [vmem:[#allocation2] sm:$0xff]  ;;  %v86_v7 = vld [vmem:[#allocation2 + $0x8] sm:$0xff]  ;;  %vm177_vm5 = vcmask 1043459  }
  0x19   :  { %v87_v8 = vpack.c.bf16 %v86_v7, %v85_v6  ;;  %v258_v10 = vld [vmem:[%s462_s4] ss:$0 sm:$0xff] }
  0x1a   :  { %234 = vmatmul.msk.bf16.vlgmr.msra.gmra.mxu0 %vm103_vm0, %v90_v5 }
  0x1b   :  { %144 = vmatpush.bf16.msra.mxu1 %v244_v4 }
  0x1e   :  { %243 = vmatmul.msk.bf16.vlgmr.msra.gmra.mxu1 %vm133_vm1, %v87_v8 }
  0x97   :  { %v116_v9 = vpop.f32.mrf.mxu0 }
  0x9b   :  { %v146_v11 = vpop.f32.mrf.mxu1 }
  0x9c   :  { %v147_v12 = vadd.f32 %v146_v11, %v116_v9 }
  0x9e   :  { %v155_v13 = vadd.f32 %v258_v10, %v147_v12 }
  0x9f   :  { %v118_v14 = vpop.f32.mrf.mxu0 }
  0xa0   :  { %259 = vtanh.f32 %v155_v13 }
  0xa3   :  { %v148_v15 = vpop.f32.mrf.mxu1 }
  0xa4   :  { %v149_v16 = vadd.f32 %v148_v15, %v118_v14 }
  0xa6   :  { %v260_v17 = vpop.eup %259  ;;  %v156_v18 = vadd.f32 %v258_v10, %v149_v16 }
  0xa7   :  { %v159_v19 = vpack.c.bf16 %v260_v17, %v260_v17 }
  0xa8   :  { %261 = vtanh.f32 %v156_v18 }
  0xa9   :  { %v163_v20 = vrot.slane %v159_v19, 3 }
  0xab   :  { %v168_v21 = vsel %vm165_vm2, %v159_v19, %v163_v20  ;;  %v170_v22 = vsel %vm169_vm3, %v159_v19, %v163_v20  ;;  %v174_v23 = vsel %vm173_vm4, %v159_v19, %v163_v20  ;;  %v178_v24 = vsel %vm177_vm5, %v159_v19, %v163_v20 }
  0xac   :  { %v172_v25 = vrot.slane %v170_v22, 1  ;;  %v176_v26 = vrot.slane %v174_v23, 2  ;;  %v180_v27 = vrot.slane %v178_v24, 3  ;;  %201 = vst [vmem:[#allocation10] sm:$0x1] %v168_v21 }
  0xae   :  { %v262_v28 = vpop.eup %261  ;;  %202 = vst [vmem:[#allocation10 + $0x1] sm:$0x1] %v172_v25 }
  0xaf   :  { %203 = vst [vmem:[#allocation10 + $0x2] sm:$0x1] %v176_v26  ;;  %v160_v29 = vpack.c.bf16 %v262_v28, %v262_v28 }
  0xb0   :  { %204 = vst [vmem:[#allocation10 + $0x3] sm:$0x1] %v180_v27 }
  0xb1   :  { %v164_v30 = vrot.slane %v160_v29, 3 }
  0xb3   :  { %v183_v31 = vsel %vm165_vm2, %v160_v29, %v164_v30  ;;  %v184_v32 = vsel %vm169_vm3, %v160_v29, %v164_v30  ;;  %v187_v33 = vsel %vm173_vm4, %v160_v29, %v164_v30  ;;  %v190_v34 = vsel %vm177_vm5, %v160_v29, %v164_v30 }
  0xb4   :  { %v186_v35 = vrot.slane %v184_v32, 1  ;;  %v189_v36 = vrot.slane %v187_v33, 2  ;;  %v192_v37 = vrot.slane %v190_v34, 3  ;;  %205 = vst [vmem:[#allocation10 + $0x4] sm:$0x1] %v183_v31 }
  0xb6   :  { %206 = vst [vmem:[#allocation10 + $0x5] sm:$0x1] %v186_v35 }
  0xb7   :  { %207 = vst [vmem:[#allocation10 + $0x6] sm:$0x1] %v189_v36 }
  0xb8   :  { %208 = vst [vmem:[#allocation10 + $0x7] sm:$0x1] %v192_v37 }
  0xb9   :  { %212 = vsyncadd [#allocation4], 112  ;;  %s215_s16 = sshll.u32 %s463_s5, 4  ;;  %s399_s17 = smov [#allocation10]   ;;  %s216_s16 = int_to_ptr.hbm [resolvable:$true] %s215_s16 }
  0xba   :  { %s213_s18 = sshll.u32 %s399_s17, 4  ;;  %s400_s19 = smov 16   ;;  %s214_s18 = int_to_ptr.vmem [resolvable:$true] %s213_s18 }
  0xbb   :  { %s401_s20 = smov 1  }
  0xbc   :  { %221 = dma.vmem_to_hbm [thread:$0]  %s214_s18, 16, %s216_s16, [#allocation4], %s400_s19, %s400_s19, %s401_s20  }
  0xbd   :  { %389 = dma.done.wait [#allocation4], 128  }
  0xbe   :  { %390 = vsyncadd [#allocation4], 4294967168 }
  0xbf   :  { %226 = vsyncpa [#allocation3], 1 }
  0xc0   :  { %227 = vsyncpa [#allocation6], 1 }
  0xc1   :  { %228 = vsyncpa [#allocation9], 1 }
  0xc2   :  { %229 = vsyncpa [#allocation4], 1 }

</bundles_post_ra>
